<compile_context>
chip_gen: v5e
topology: v5e:2x2
jax: 0.10.0
libtpu: 0.0.40
codegen_flags: <defaults>
</compile_context>

<pallas_src>
import jax
import jax.numpy as jnp
from jax.experimental import pallas as pl
from jax.experimental.pallas import tpu as pltpu


def _round_up(x, m):
    return ((x + m - 1) // m) * m


def _vmem_cap_bytes():
    """Generation-aware VMEM budget: 75% of physical, leaving Mosaic headroom."""
    try:
        phys = pltpu.get_tpu_info().vmem_capacity_bytes
    except Exception:
        phys = 64 * 1024 * 1024          # conservative: v7x per-TC physical VMEM
    return int(phys * 3 // 4)            # ~48 MiB on v7x, ~96 MiB on v5e/v6e


# -----------------------------------------------------------------------------
# Kernel 1: feature transform XW = x @ W  (tiny, done once, bf16 in/out, f32 acc)
# -----------------------------------------------------------------------------
def xw_kernel(x_ref, w_ref, o_ref):
    o_ref[...] = jnp.dot(
        x_ref[...], w_ref[...], preferred_element_type=jnp.float32
    ).astype(o_ref.dtype)


# -----------------------------------------------------------------------------
# Kernel 2: tiled aggregation  A_hat @ XW  + bias + PReLU
#   - accumulate directly into the f32 output ref (resident across k axis)
#   - "resident" variant: XW block is the whole (n_pad, h_pad) array, sliced by k
#   - "stream"   variant: XW block is a (tk, h_pad) contraction slab
# -----------------------------------------------------------------------------
def agg_prelu_resident_kernel(a_ref, xw_ref, b_ref, alpha_ref, o_ref):
    k = pl.program_id(1)
    tk = a_ref.shape[1]

    @pl.when(k == 0)
    def _init():
        o_ref[...] = jnp.zeros_like(o_ref)

    off = pl.multiple_of(k * tk, 128)
    o_ref[...] += jnp.dot(
        a_ref[...], xw_ref[pl.ds(off, tk), :], preferred_element_type=jnp.float32
    )

    @pl.when(k == pl.num_programs(1) - 1)
    def _finalize():
        z = o_ref[...] + b_ref[...]                      # bias (epilogue only)
        o_ref[...] = jnp.where(z > 0.0, z, alpha_ref[...] * z)


def agg_prelu_stream_kernel(a_ref, xw_ref, b_ref, alpha_ref, o_ref):
    k = pl.program_id(1)

    @pl.when(k == 0)
    def _init():
        o_ref[...] = jnp.zeros_like(o_ref)

    o_ref[...] += jnp.dot(
        a_ref[...], xw_ref[...], preferred_element_type=jnp.float32
    )

    @pl.when(k == pl.num_programs(1) - 1)
    def _finalize():
        z = o_ref[...] + b_ref[...]
        o_ref[...] = jnp.where(z > 0.0, z, alpha_ref[...] * z)


# -----------------------------------------------------------------------------
# Glue: D^-1/2 (A + I) D^-1/2 scattered directly into a padded `dtype` buffer
# -----------------------------------------------------------------------------
def gcn_normalized_adj_padded(edge_index, num_nodes, n_pad, dtype=jnp.bfloat16):
    loops = jnp.arange(num_nodes, dtype=edge_index.dtype)
    row = jnp.concatenate([edge_index[0], loops])    # source
    col = jnp.concatenate([edge_index[1], loops])    # target (aggregation index)
    ew = jnp.ones(row.shape[0], dtype=jnp.float32)
    deg = jnp.zeros((num_nodes,), jnp.float32).at[col].add(ew)
    dinv = jnp.where(deg > 0.0, 1.0 / jnp.sqrt(deg), 0.0)
    norm = dinv[row] * ew * dinv[col]
    # out[col] += norm * (XW)[row]  ==>  A_hat[col, row] = norm
    return jnp.zeros((n_pad, n_pad), dtype).at[col, row].add(norm.astype(dtype))


# -----------------------------------------------------------------------------
# Wrapper: padding, generation-aware tiling, two pallas_calls
# -----------------------------------------------------------------------------
def encoder_forward(x, edge_index, weight, bias, alpha, *, max_tile=2048):
    """x: (N, F) f32, edge_index: (2, E) int, weight: (F, H), bias/alpha: (1, H)."""
    n, f = x.shape
    h = weight.shape[1]

    # Hidden dim lane-dense at 128 (bump to 256 only if MXU-bound — today the
    # dense path is HBM-bound on the A_hat stream).
    h_pad = _round_up(h, 128)
    cap = _vmem_cap_bytes()

    # ---- tile selection: big tk amortizes step overhead, tm decoupled --------
    if n <= max_tile:
        n_pad = _round_up(n, 128)
        tm = tk = n_pad
    else:
        n_pad = _round_up(n, max_tile)
        tk = max_tile                   # large contraction tile (16 MiB @ 2048 bf16, 2x buf)
        tm = max(128, max_tile // 2)    # smaller row tile keeps the f32 output tile modest

    # Keep XW fully VMEM-resident across the whole aggregation when it fits.
    xw_resident = (2 * n_pad * h_pad * 2) <= cap // 3

    def agg_vmem(tm_, tk_, resident):
        a_b = 2 * tm_ * tk_ * 2                                     # A tile (bf16), 2x buf
        xw_b = (2 * n_pad * h_pad * 2) if resident else (2 * tk_ * h_pad * 2)
        out_b = 2 * tm_ * h_pad * 4                                 # f32 output/accumulator
        return a_b + xw_b + out_b + 4 * h_pad * 4                   # + bias/alpha

    # Shrink tiles until the estimate fits the budget (keeps (8,128) / divisibility).
    while agg_vmem(tm, tk, xw_resident) > int(cap * 0.9):
        new_tk = tk // 2
        if new_tk >= 256 and new_tk % 128 == 0 and n_pad % new_tk == 0:
            tk = new_tk
            continue
        new_tm = tm // 2
        if new_tm >= 128 and new_tm % 8 == 0 and n_pad % new_tm == 0:
            tm = new_tm
            continue
        break
    if xw_resident and agg_vmem(tm, tk, xw_resident) > int(cap * 0.9):
        xw_resident = False             # fall back to streaming XW blocks

    # ---- inputs: A_hat built padded + bf16 directly; small arrays padded -----
    a_p = gcn_normalized_adj_padded(edge_index, n, n_pad, dtype=jnp.bfloat16)
    x_p = jnp.pad(x, ((0, n_pad - n), (0, 0))).astype(jnp.bfloat16)
    w_p = jnp.pad(weight, ((0, 0), (0, h_pad - h))).astype(jnp.bfloat16)
    b_p = jnp.pad(bias, ((0, 0), (0, h_pad - h)))
    alpha_p = jnp.pad(alpha, ((0, 0), (0, h_pad - h)))

    # ---- 1) XW once (hoisted out of the aggregation loop) --------------------
    xw_vmem_est = 2 * tm * f * 2 + 2 * f * h_pad * 2 + 2 * tm * h_pad * 2
    if xw_vmem_est > int(cap * 0.8):
        # W too large to hold resident: let XLA do it (XW is a negligible share
        # of total flops/bytes vs the N^2 aggregation).
        xw = jnp.dot(x_p, w_p, preferred_element_type=jnp.float32
                     ).astype(jnp.bfloat16)
    else:
        xw = pl.pallas_call(
            xw_kernel,
            out_shape=jax.ShapeDtypeStruct((n_pad, h_pad), jnp.bfloat16),
            grid=(n_pad // tm,),
            in_specs=[
                pl.BlockSpec((tm, f), lambda i: (i, 0)),
                pl.BlockSpec((f, h_pad), lambda i: (0, 0)),
            ],
            out_specs=pl.BlockSpec((tm, h_pad), lambda i: (i, 0)),
            compiler_params=pltpu.CompilerParams(
                dimension_semantics=("parallel",),
                vmem_limit_bytes=min(cap, max(int(xw_vmem_est * 1.5),
                                              16 * 1024 * 1024))),
        )(x_p, w_p)

    # ---- 2) tiled aggregation + bias + PReLU ----------------------------------
    grid = (n_pad // tm, n_pad // tk)
    n_row_tiles = grid[0]

    if xw_resident:
        kernel = agg_prelu_resident_kernel
        xw_spec = pl.BlockSpec((n_pad, h_pad), lambda i, k: (0, 0))   # loaded once
        xw_bytes_read = n_pad * h_pad * 2
    else:
        kernel = agg_prelu_stream_kernel
        xw_spec = pl.BlockSpec((tk, h_pad), lambda i, k: (k, 0))      # re-read per row tile
        xw_bytes_read = n_row_tiles * n_pad * h_pad * 2

    vmem_limit = min(cap, max(int(agg_vmem(tm, tk, xw_resident) * 1.5),
                              32 * 1024 * 1024))

    cost = pl.CostEstimate(
        flops=2 * n_pad * n_pad * h_pad,
        transcendentals=0,
        bytes_accessed=(n_pad * n_pad * 2        # A_hat (bf16)
                        + xw_bytes_read          # XW (once if resident)
                        + n_pad * h_pad * 4      # f32 output write-back
                        + 2 * h_pad * 4),        # bias + alpha
    )

    out = pl.pallas_call(
        kernel,
        out_shape=jax.ShapeDtypeStruct((n_pad, h_pad), jnp.float32),
        grid=grid,
        in_specs=[
            pl.BlockSpec((tm, tk), lambda i, k: (i, k)),      # A_hat row/contraction tile
            xw_spec,                                          # XW (resident or streamed)
            pl.BlockSpec((1, h_pad), lambda i, k: (0, 0)),    # bias (loaded once)
            pl.BlockSpec((1, h_pad), lambda i, k: (0, 0)),    # alpha (loaded once)
        ],
        out_specs=pl.BlockSpec((tm, h_pad), lambda i, k: (i, 0)),
        compiler_params=pltpu.CompilerParams(
            # TODO(synk): on v7x switch the row axis to pltpu.CORE_PARALLEL to
            # shard across the 2 TensorCores once the kernel is off HBM roofline.
            dimension_semantics=("parallel", "arbitrary"),
            vmem_limit_bytes=vmem_limit),
        cost_estimate=cost,
    )(a_p, xw, b_p, alpha_p)

    return out[:n, :h]


# -----------------------------------------------------------------------------
# Deterministic parameter init (GCNConv glorot weight, zero bias, PReLU 0.25)
# -----------------------------------------------------------------------------
def init_params(key, in_channels, hidden_channels):
    (k_w,) = jax.random.split(key, 1)
    limit = jnp.sqrt(6.0 / (in_channels + hidden_channels))  # glorot uniform
    weight = jax.random.uniform(
        k_w, (in_channels, hidden_channels), jnp.float32, -limit, limit)
    bias = jnp.zeros((1, hidden_channels), jnp.float32)
    alpha = jnp.full((1, hidden_channels), 0.25, jnp.float32)  # nn.PReLU default
    return weight, bias, alpha


if __name__ == "__main__":
    N = 16              # number of nodes
    IN_CH = 8           # in_channels
    HID = 32            # hidden_channels

    key = jax.random.PRNGKey(0)
    k_x, k_p = jax.random.split(key)

    x = jax.random.normal(k_x, (N, IN_CH), jnp.float32)

    # Deterministic small graph: bidirectional ring
    src = jnp.arange(N, dtype=jnp.int32)
    dst = (src + 1) % N
    edge_index = jnp.stack(
        [jnp.concatenate([src, dst]), jnp.concatenate([dst, src])], axis=0)

    weight, bias, alpha = init_params(k_p, IN_CH, HID)

    out = encoder_forward(x, edge_index, weight, bias, alpha)
    out = jax.block_until_ready(out)
    assert out.shape == (N, HID)

    # Reference matching the kernel's bf16 A_hat / bf16 XW numerics
    a_f32 = gcn_normalized_adj_padded(edge_index, N, N, dtype=jnp.float32)
    a_bf = a_f32.astype(jnp.bfloat16).astype(jnp.float32)
    xw_bf = jnp.dot(x.astype(jnp.bfloat16), weight.astype(jnp.bfloat16),
                    preferred_element_type=jnp.float32
                    ).astype(jnp.bfloat16).astype(jnp.float32)
    h_bf = a_bf @ xw_bf + bias
    ref_bf = jnp.where(h_bf > 0.0, h_bf, alpha * h_bf)
    assert jnp.allclose(out, ref_bf, atol=5e-3, rtol=5e-3), "bf16-matched ref mismatch"

    # Full-f32 semantic sanity check (bounds the bf16 streaming error)
    h32 = a_f32 @ (x @ weight) + bias
    ref32 = jnp.where(h32 > 0.0, h32, alpha * h32)
    assert jnp.allclose(out, ref32, atol=2.5e-2, rtol=2.5e-2), "f32 semantic mismatch"

    print("KERNEL_OK")
</pallas_src>

<mosaic_0001>
module attributes {stable_mosaic.version = 11 : i64} {
  func.func @xw_kernel(%arg0: i32, %arg1: memref<128x8xbf16, #tpu.memory_space<vmem>>, %arg2: memref<8x128xbf16, #tpu.memory_space<vmem>>, %arg3: memref<128x128xbf16, #tpu.memory_space<vmem>>) attributes {dimension_semantics = [#tpu.dimension_semantics<parallel>], iteration_bounds = array<i64: 1>, scalar_prefetch = 0 : i64, scratch_operands = 0 : i64, tpu.core_type = #tpu.core_type<tc>, window_params = [{transform_indices = @transform_0, window_bounds = array<i64: 128, 8>}, {pipeline_mode = #tpu.pipeline_mode<synchronous>, transform_indices = @transform_1, window_bounds = array<i64: 8, 128>}, {transform_indices = @transform_2, window_bounds = array<i64: 128, 128>}]} {
    %c0 = arith.constant 0 : index
    %c0_0 = arith.constant 0 : index
    %0 = vector.load %arg1[%c0, %c0_0] : memref<128x8xbf16, #tpu.memory_space<vmem>>, vector<128x8xbf16>
    %c0_1 = arith.constant 0 : index
    %c0_2 = arith.constant 0 : index
    %1 = vector.load %arg2[%c0_1, %c0_2] : memref<8x128xbf16, #tpu.memory_space<vmem>>, vector<8x128xbf16>
    %cst = arith.constant dense<0.000000e+00> : vector<128x128xf32>
    %2 = tpu.matmul %0, %1, %cst {dimension_numbers = #tpu.dot_dimension_numbers<[1], [0], [0], [1], [0, 0, 1, 1], [], []>} : vector<128x8xbf16>, vector<8x128xbf16>, vector<128x128xf32> -> vector<128x128xf32>
    %3 = arith.truncf %2 : vector<128x128xf32> to vector<128x128xbf16>
    %c0_3 = arith.constant 0 : index
    %c0_4 = arith.constant 0 : index
    %4 = vector.load %arg3[%c0_3, %c0_4] : memref<128x128xbf16, #tpu.memory_space<vmem>>, vector<128x128xbf16>
    tpu.vector_store %arg3[%c0_3, %c0_4], %3 {strides = array<i32>} : memref<128x128xbf16, #tpu.memory_space<vmem>>, vector<128x128xbf16>,
    return
  }
  func.func @transform_0(%arg0: i32) -> (i32, i32) {
    %c0_i32 = arith.constant 0 : i32
    %c0_i32_0 = arith.constant 0 : i32
    return %arg0, %c0_i32 : i32, i32
  }
  func.func @transform_1(%arg0: i32) -> (i32, i32) {
    %c0_i32 = arith.constant 0 : i32
    %c0_i32_0 = arith.constant 0 : i32
    %c0_i32_1 = arith.constant 0 : i32
    return %c0_i32, %c0_i32_0 : i32, i32
  }
  func.func @transform_2(%arg0: i32) -> (i32, i32) {
    %c0_i32 = arith.constant 0 : i32
    %c0_i32_0 = arith.constant 0 : i32
    return %arg0, %c0_i32 : i32, i32
  }
}

</mosaic_0001>

<bundles_post_ra>
// kernel: tpu_custom_call.1
= control target key start
LH: loop header
LB: loop body
LE: loop exit
PB: predicated region body
PF: predicated region fallthrough
CT: control target
= control target key end

     0   :  { %vm95_vm0 = vcmask 1043456   ;;  %vm70_vm1 = vcmask 64512   ;;  %s381_s0 = inlined_call_operand.vmem [shape: bf16[128,8], index: 0, kind: input, shape index: {}]   ;;  %s382_s1 = inlined_call_operand.vmem [shape: bf16[8,128], index: 1, kind: input, shape index: {}]   ;;  %s383_s2 = inlined_call_operand.hbm [shape: bf16[128,128], index: 2, kind: output, shape index: {}]  }
   0x1   :  { %v29_v0 = vld [vmem:[%s382_s1] sm:$0xf]  ;;  %v240_v3 = vld [vmem:[%s381_s0 + $0x10] sm:$0xff] }
   0x2   :  { %v97_v1 = vsel %vm95_vm0, %v29_v0, 0  ;;  %v238_v2 = vld [vmem:[%s381_s0] sm:$0xff]  ;;  %v244_v5 = vld [vmem:[%s381_s0 + $0x30] sm:$0xff] }
   0x3   :  { %106 = vmatpush.bf16.msra.mxu0 %v97_v1  ;;  %293 = vmatpush.bf16.msra.mxu1 %v97_v1  ;;  %v242_v4 = vld [vmem:[%s381_s0 + $0x20] sm:$0xff] }
   0x4   :  { %294 = vmatpush.bf16.msra.mxu2 %v97_v1  ;;  %295 = vmatpush.bf16.msra.mxu3 %v97_v1 }
   0x5   :  { %7 = vsyncpa [#allocation3], 0  ;;  %v239_v6 = vld [vmem:[%s381_s0 + $0x8] sm:$0xff]  ;;  %v241_v7 = vld [vmem:[%s381_s0 + $0x18] sm:$0xff]  ;;  %s186_s29 = sshll.u32 %s383_s2, 4  ;;  %s326_s30 = smov 64   ;;  %s187_s29 = int_to_ptr.hbm [resolvable:$true] %s186_s29 }
   0x6   :  { %230 = vmatmul.msk.bf16.vlgmr.msra.gmra.mxu0 %vm70_vm1, %v238_v2  ;;  %232 = vmatmul.msk.bf16.vlgmr.msra.gmra.mxu1 %vm70_vm1, %v240_v3  ;;  %v243_v8 = vld [vmem:[%s381_s0 + $0x28] sm:$0xff]  ;;  %v245_v9 = vld [vmem:[%s381_s0 + $0x38] sm:$0xff]  ;;  %s325_s0 = smov [#allocation2]   ;;  %s327_s3 = smov 4  }
   0x7   :  { %234 = vmatmul.msk.bf16.vlgmr.msra.gmra.mxu2 %vm70_vm1, %v242_v4  ;;  %236 = vmatmul.msk.bf16.vlgmr.msra.gmra.mxu3 %vm70_vm1, %v244_v5  ;;  %s184_s26 = sshll.u32 %s325_s0, 4  ;;  %s185_s26 = int_to_ptr.vmem [resolvable:$true] %s184_s26 }
  0x16   :  { %231 = vmatmul.msk.bf16.gmra.mxu0 %vm70_vm1, %v239_v6  ;;  %233 = vmatmul.msk.bf16.gmra.mxu1 %vm70_vm1, %v241_v7 }
  0x17   :  { %235 = vmatmul.msk.bf16.gmra.mxu2 %vm70_vm1, %v243_v8  ;;  %237 = vmatmul.msk.bf16.gmra.mxu3 %vm70_vm1, %v245_v9 }
  0x83   :  { %v108_v10 = vpop.f32.mrf.mxu0  ;;  %v118_v11 = vpop.f32.mrf.mxu1 }
  0x8a   :  { %v128_v12 = vpop.f32.mrf.mxu2  ;;  %v138_v13 = vpop.f32.mrf.mxu3 }
  0x8b   :  { %v110_v14 = vpop.f32.mrf.mxu0  ;;  %v120_v15 = vpop.f32.mrf.mxu1 }
  0x8c   :  { %v249_v16 = vpack.c.bf16 %v110_v14, %v108_v10  ;;  %v259_v17 = vpack.c.bf16 %v120_v15, %v118_v11 }
  0x8e   :  { %250 = vst [vmem:[#allocation2] sm:$0xff] %v249_v16  }
  0x8f   :  { %287 = vst [vmem:[#allocation2 + $0x10] sm:$0xff] %v259_v17  }
  0x92   :  { %v130_v18 = vpop.f32.mrf.mxu2  ;;  %v140_v19 = vpop.f32.mrf.mxu3 }
  0x93   :  { %v269_v20 = vpack.c.bf16 %v130_v18, %v128_v12  ;;  %v279_v21 = vpack.c.bf16 %v140_v19, %v138_v13  ;;  %v113_v22 = vpop.f32.mrf.mxu0  ;;  %v123_v23 = vpop.f32.mrf.mxu1 }
  0x95   :  { %289 = vst [vmem:[#allocation2 + $0x20] sm:$0xff] %v269_v20  }
  0x96   :  { %291 = vst [vmem:[#allocation2 + $0x30] sm:$0xff] %v279_v21  }
  0x9a   :  { %v133_v24 = vpop.f32.mrf.mxu2  ;;  %v143_v25 = vpop.f32.mrf.mxu3 }
  0x9b   :  { %v115_v26 = vpop.f32.mrf.mxu0  ;;  %v125_v27 = vpop.f32.mrf.mxu1 }
  0x9c   :  { %v254_v28 = vpack.c.bf16 %v115_v26, %v113_v22  ;;  %v264_v29 = vpack.c.bf16 %v125_v27, %v123_v23 }
  0x9e   :  { %286 = vst [vmem:[#allocation2 + $0x8] sm:$0xff] %v254_v28  }
  0x9f   :  { %288 = vst [vmem:[#allocation2 + $0x18] sm:$0xff] %v264_v29  }
  0xa2   :  { %v135_v30 = vpop.f32.mrf.mxu2  ;;  %v145_v31 = vpop.f32.mrf.mxu3 }
  0xa3   :  { %v274_v32 = vpack.c.bf16 %v135_v30, %v133_v24  ;;  %v284_v33 = vpack.c.bf16 %v145_v31, %v143_v25 }
  0xa5   :  { %290 = vst [vmem:[#allocation2 + $0x28] sm:$0xff] %v274_v32  }
  0xa6   :  { %292 = vst [vmem:[#allocation2 + $0x38] sm:$0xff] %v284_v33  }
  0xa7   :  { %192 = dma.vmem_to_hbm [thread:$0]  %s185_s26, 1024, %s187_s29, [#allocation3], %s326_s30, %s326_s30, %s327_s3  }
  0xa8   :  { %323 = dma.done.wait [#allocation3], 1024  }
  0xa9   :  { %324 = vsyncadd [#allocation3], 4294966272 }
  0xaa   :  { %197 = vsyncpa [#allocation3], 1 }

</bundles_post_ra>
